<compile_context>
chip_gen: v5e
topology: v5e:2x2
jax: 0.10.0
libtpu: 0.0.40
codegen_flags: <defaults>
</compile_context>

<pallas_src>
import functools

import jax
import jax.numpy as jnp
import numpy as np
from jax import lax
from jax.experimental import pallas as pl
from jax.experimental.pallas import tpu as pltpu

F32 = jnp.float32


# ----------------------------------------------------------------------------
# Pallas kernel
# ----------------------------------------------------------------------------

def _gem_kernel(p_ref, a_ref, x_ref, o_ref, *, k, lsub, n_chunks, eps,
                lk_total, mask_cols, static_p):
    # p_ref: (1,) f32 in SMEM (scalar path)
    # a_ref: (k*lsub, lsub) f32 block-diagonal averaging matrix, VMEM-resident
    # x_ref: (rm, k*lblk) contiguous input block along L
    # o_ref: (rm, lblk) lane-dense output block (lblk = n_chunks * lsub)
    if static_p is not None:
        p_exp = int(static_p)
        inv_p = 1.0 / float(static_p)
    else:
        p = p_ref[0]
        inv_p = 1.0 / p                      # hoisted scalar divide

    a = a_ref[...]
    blk_w = n_chunks * k * lsub
    col_base = pl.program_id(1) * blk_w      # first L-column of this block

    for s in range(n_chunks):
        xs = x_ref[:, s * k * lsub:(s + 1) * k * lsub].astype(F32)

        if mask_cols:
            # Neutralize columns past the pooled range (tail of L and the
            # OOB/garbage region of partial edge blocks) so NaN/Inf garbage
            # can never leak into valid outputs through the MXU reduction.
            col = col_base + s * k * lsub + lax.broadcasted_iota(
                jnp.int32, xs.shape, 1)
            xs = jnp.where(col < lk_total, xs, 1.0)

        xc = jnp.maximum(xs, eps)            # clamp(min=eps)

        if static_p is not None:
            # Integer-p fast path: binary exponentiation on the VPU (keeps the
            # single EUP slot free; per-element exp/log eliminated).
            xp, base, e = None, xc, p_exp
            while e:
                if e & 1:
                    xp = base if xp is None else xp * base
                e >>= 1
                if e:
                    base = base * base
        else:
            xp = jnp.exp(p * jnp.log(xc))    # general learnable p (EUP)

        # Window mean on the MXU: block-diagonal A already carries the 1/k.
        # (Note: a NaN anywhere in a valid 128-output chunk row would spread
        # within that chunk via 0*NaN; degenerate-input behaviour only.)
        m = jnp.dot(xp, a, preferred_element_type=F32)

        o_ref[:, s * lsub:(s + 1) * lsub] = jnp.exp(
            jnp.log(m) * inv_p).astype(o_ref.dtype)


# ----------------------------------------------------------------------------
# Tile-size selection
# ----------------------------------------------------------------------------

def _choose_tiles(rows, Lo, k, itemsize):
    # Lane (pooled-position) block: prefer full extent for small Lo, otherwise
    # a multiple of 128 sized so the input block stays around <= 4 MiB.
    if Lo <= 256:
        lblk = Lo
        lsub = 128 if Lo % 128 == 0 else Lo
    else:
        lane_blocks = max(1, min((4096 // k) // 128, Lo // 128, 8))
        lblk = 128 * lane_blocks
        lsub = 128

    # Row block: up to 256 rows (multiple of 8), shrunk if the input block
    # would exceed ~4 MiB (keeps double-buffered working set ~<=10 MiB so the
    # default scoped VMEM on v5e/v6e/v7x is enough).
    if rows < 8:
        rm = rows
    else:
        rm = min(256, (rows // 8) * 8)
        while rm > 8 and rm * k * lblk * itemsize > (4 << 20):
            rm = max(8, ((rm // 2) // 8) * 8)

    # v7x megacore: keep >= 2 grid blocks when the shape allows it so both
    # TensorCores get work.
    if pl.cdiv(rows, rm) * pl.cdiv(Lo, lblk) < 2:
        if rows >= 16:
            rm = max(8, ((rm // 2) // 8) * 8)
        elif lblk % 256 == 0:
            lblk //= 2

    return rm, lblk, lsub


# ----------------------------------------------------------------------------
# Wrapper
# ----------------------------------------------------------------------------

def gem_pool1d(x, p, kernel_size, eps=1e-6, static_p=None):
    """GeM pooling over the last axis: (B, C, L) -> (B, C, L // kernel_size).

    `p` is the learnable exponent (shape (1,) like the nn.Parameter).  If the
    caller can promise p is a small positive integer (module default p=3),
    pass `static_p` to enable the VPU fast path.
    """
    B, C, L = x.shape
    k = int(kernel_size)
    Lo = L // k
    assert Lo >= 1, "sequence shorter than the pooling window"
    rows = B * C
    Lk = Lo * k                                   # pooled coverage (tail dropped)

    x2 = x.reshape(rows, L)                       # free: collapse leading dims

    rm, lblk, lsub = _choose_tiles(rows, Lo, k, x.dtype.itemsize)
    n_chunks = lblk // lsub
    grid_rows = pl.cdiv(rows, rm)
    grid_lo = pl.cdiv(Lo, lblk)
    # Masking only needed if the lane blocks reach past the pooled range.
    mask_cols = grid_lo * k * lblk > Lk

    # Block-diagonal window-averaging matrix (1/k entries), fetched once and
    # kept resident in VMEM (constant index_map).
    a_np = np.zeros((k * lsub, lsub), np.float32)
    for j in range(lsub):
        a_np[j * k:(j + 1) * k, j] = 1.0 / k
    a_mat = jnp.asarray(a_np)

    p_arr = jnp.reshape(jnp.asarray(p, dtype=F32), (1,))   # SMEM scalar

    sp = None
    if static_p is not None and float(static_p).is_integer() \
            and 1 <= int(static_p) <= 16:
        sp = int(static_p)

    kern = functools.partial(
        _gem_kernel, k=k, lsub=lsub, n_chunks=n_chunks, eps=float(eps),
        lk_total=Lk, mask_cols=bool(mask_cols), static_p=sp)

    out = pl.pallas_call(
        kern,
        out_shape=jax.ShapeDtypeStruct((rows, Lo), x.dtype),
        grid=(grid_rows, grid_lo),
        in_specs=[
            pl.BlockSpec(memory_space=pltpu.MemorySpace.SMEM),       # p
            pl.BlockSpec((k * lsub, lsub), lambda i, j: (0, 0)),     # A (resident)
            pl.BlockSpec((rm, k * lblk), lambda i, j: (i, j)),       # x
        ],
        out_specs=pl.BlockSpec((rm, lblk), lambda i, j: (i, j)),
        compiler_params=pltpu.CompilerParams(
            dimension_semantics=("parallel", "parallel"),
            vmem_limit_bytes=32 * 1024 * 1024,
        ),
    )(p_arr, a_mat, x2)

    return out.reshape(B, C, Lo)


# ----------------------------------------------------------------------------
# Pure-JAX reference (for correctness check)
# ----------------------------------------------------------------------------

def gem_ref(x, p, kernel_size, eps=1e-6):
    B, C, L = x.shape
    k = int(kernel_size)
    Lo = L // k
    xc = jnp.maximum(x[:, :, :Lo * k].astype(F32), eps)
    xp = xc ** p
    m = jnp.mean(xp.reshape(B, C, Lo, k), axis=-1)
    return (m ** (1.0 / p)).astype(x.dtype)


# ----------------------------------------------------------------------------
# Main
# ----------------------------------------------------------------------------

if __name__ == "__main__":
    key = jax.random.PRNGKey(0)
    k1, k2, k3 = jax.random.split(key, 3)

    # nn.Parameter(torch.ones(1) * 3)
    p = jnp.ones((1,), F32) * 3.0

    # Case 1: module defaults (kernel_size=8), Lo=128, static-p fast path.
    x1 = jax.random.normal(k1, (2, 4, 1024), F32)
    # Case 2: ragged Lo=73, partial row blocks, general learnable-p path.
    x2 = jax.random.normal(k2, (3, 5, 292), F32)
    # Case 3: multi-block lane tiling + edge masking (Lo=300, L%k tail drop).
    x3 = jax.random.normal(k3, (2, 3, 2405), F32)

    f1 = jax.jit(functools.partial(gem_pool1d, kernel_size=8, static_p=3))
    f2 = jax.jit(functools.partial(gem_pool1d, kernel_size=4))   # general p
    f3 = jax.jit(functools.partial(gem_pool1d, kernel_size=8, static_p=3))

    y1 = jax.block_until_ready(f1(x1, p))
    y2 = jax.block_until_ready(f2(x2, p))
    y3 = jax.block_until_ready(f3(x3, p))

    assert y1.shape == (2, 4, 128), y1.shape
    assert y2.shape == (3, 5, 73), y2.shape
    assert y3.shape == (2, 3, 300), y3.shape

    r1 = gem_ref(x1, 3.0, 8)
    r2 = gem_ref(x2, 3.0, 4)
    r3 = gem_ref(x3, 3.0, 8)
    np.testing.assert_allclose(np.asarray(y1), np.asarray(r1), rtol=2e-4, atol=2e-5)
    np.testing.assert_allclose(np.asarray(y2), np.asarray(r2), rtol=2e-4, atol=2e-5)
    np.testing.assert_allclose(np.asarray(y3), np.asarray(r3), rtol=2e-4, atol=2e-5)

    print("KERNEL_OK")
</pallas_src>

<mosaic_0001>
module attributes {stable_mosaic.version = 11 : i64} {
  func.func @_gem_kernel(%arg0: i32, %arg1: i32, %arg2: memref<1xf32, #tpu.memory_space<smem>>, %arg3: memref<1024x128xf32, #tpu.memory_space<vmem>>, %arg4: memref<8x1024xf32, #tpu.memory_space<vmem>>, %arg5: memref<8x128xf32, #tpu.memory_space<vmem>>) attributes {dimension_semantics = [#tpu.dimension_semantics<parallel>, #tpu.dimension_semantics<parallel>], iteration_bounds = array<i64: 1, 1>, scalar_prefetch = 0 : i64, scratch_operands = 0 : i64, tpu.core_type = #tpu.core_type<tc>, window_params = [{transform_indices = @transform_0, window_bounds = array<i64: 1>}, {pipeline_mode = #tpu.pipeline_mode<synchronous>, transform_indices = @transform_1, window_bounds = array<i64: 1024, 128>}, {transform_indices = @transform_2, window_bounds = array<i64: 8, 1024>}, {transform_indices = @transform_3, window_bounds = array<i64: 8, 128>}]} {
    %c0 = arith.constant 0 : index
    %c0_0 = arith.constant 0 : index
    %0 = vector.load %arg3[%c0, %c0_0] : memref<1024x128xf32, #tpu.memory_space<vmem>>, vector<1024x128xf32>
    %c0_1 = arith.constant 0 : index
    %c0_2 = arith.constant 0 : index
    %1 = vector.load %arg4[%c0_1, %c0_2] : memref<8x1024xf32, #tpu.memory_space<vmem>>, vector<8x1024xf32>
    %cst = arith.constant 9.99999997E-7 : f32
    %2 = vector.broadcast %cst : f32 to vector<8x1024xf32>
    %3 = arith.maximumf %1, %2 : vector<8x1024xf32>
    %4 = arith.mulf %3, %3 : vector<8x1024xf32>
    %5 = arith.mulf %3, %4 : vector<8x1024xf32>
    %cst_3 = arith.constant dense<0.000000e+00> : vector<8x128xf32>
    %6 = tpu.matmul %5, %0, %cst_3 {dimension_numbers = #tpu.dot_dimension_numbers<[1], [0], [0], [1], [0, 0, 1, 1], [], []>} : vector<8x1024xf32>, vector<1024x128xf32>, vector<8x128xf32> -> vector<8x128xf32>
    %7 = math.log %6 : vector<8x128xf32>
    %cst_4 = arith.constant 0.333333343 : f32
    %8 = vector.broadcast %cst_4 : f32 to vector<8x128xf32>
    %9 = arith.mulf %7, %8 : vector<8x128xf32>
    %10 = math.exp %9 : vector<8x128xf32>
    %c0_5 = arith.constant 0 : index
    %c0_6 = arith.constant 0 : index
    %11 = vector.load %arg5[%c0_5, %c0_6] : memref<8x128xf32, #tpu.memory_space<vmem>>, vector<8x128xf32>
    tpu.vector_store %arg5[%c0_5, %c0_6], %10 {strides = array<i32>} : memref<8x128xf32, #tpu.memory_space<vmem>>, vector<8x128xf32>,
    return
  }
  func.func @transform_0(%arg0: i32, %arg1: i32) -> i32 {
    %c0_i32 = arith.constant 0 : i32
    %c0_i32_0 = arith.constant 0 : i32
    return %c0_i32 : i32
  }
  func.func @transform_1(%arg0: i32, %arg1: i32) -> (i32, i32) {
    %c0_i32 = arith.constant 0 : i32
    %c0_i32_0 = arith.constant 0 : i32
    %c0_i32_1 = arith.constant 0 : i32
    return %c0_i32, %c0_i32_0 : i32, i32
  }
  func.func @transform_2(%arg0: i32, %arg1: i32) -> (i32, i32) {
    %c0_i32 = arith.constant 0 : i32
    return %arg0, %arg1 : i32, i32
  }
  func.func @transform_3(%arg0: i32, %arg1: i32) -> (i32, i32) {
    %c0_i32 = arith.constant 0 : i32
    return %arg0, %arg1 : i32, i32
  }
}

</mosaic_0001>

<bundles_post_ra>
// kernel: gem_pool1d.1
= control target key start
LH: loop header
LB: loop body
LE: loop exit
PB: predicated region body
PF: predicated region fallthrough
CT: control target
= control target key end

     0   :  { %9 = vsyncpa [#allocation4], 0  ;;  %s489_s0 = inlined_call_operand.<no memory space> [shape: f32[1], index: 0, kind: input, shape index: {}]   ;;  %s490_s1 = inlined_call_operand.hbm [shape: f32[1024,128], index: 1, kind: input, shape index: {}]   ;;  %s491_s2 = inlined_call_operand.vmem [shape: f32[8,1024], index: 2, kind: input, shape index: {}]   ;;  %s492_s3 = inlined_call_operand.hbm [shape: f32[8,128], index: 3, kind: output, shape index: {}]  }
   0x1   :  { %10 = vsyncpa [#allocation5], 0  ;;  %s17_s14 = sshll.u32 %s490_s1, 4  ;;  %s435_s15 = smov [#allocation3]   ;;  %s18_s14 = int_to_ptr.hbm [resolvable:$true] %s17_s14 }
   0x2   :  { %s19_s16 = sshll.u32 %s435_s15, 4  ;;  %s436_s0 = smov 128   ;;  %s20_s16 = int_to_ptr.vmem [resolvable:$true] %s19_s16 }
   0x3   :  { %s437_s17 = smov 8  }
   0x4   :  { %25 = dma.hbm_to_vmem [thread:$0]  %s18_s14, 16384, %s20_s16, [#allocation4], %s436_s0, %s436_s0, %s437_s17  }
   0x5   :  { %431 = dma.done.wait [#allocation4], 16384  }
   0x6   :  { %432 = vsyncadd [#allocation4], 4294950912  ;;  %v47_v0 = vld [vmem:[#allocation3 + $0x78] sm:$0xff]  ;;  %v46_v2 = vld [vmem:[#allocation3 + $0x70] sm:$0xff]  ;;  %s365_s9 = sshll.u32 %s492_s3, 4  ;;  %s366_s9 = int_to_ptr.hbm [resolvable:$true] %s365_s9 }
   0x7   :  { %v79_v1 = vld [vmem:[#allocation3 + $0x178] sm:$0xff]  ;;  %192 = vmatpush.msra.mxu0 %v47_v0  ;;  %v78_v4 = vld [vmem:[#allocation3 + $0x170] sm:$0xff]  ;;  %v45_v6 = vld [vmem:[#allocation3 + $0x68] sm:$0xff] }
   0x8   :  { %232 = vmatpush.msra.mxu2 %v79_v1  ;;  %v63_v3 = vld [vmem:[#allocation3 + $0xf8] sm:$0xff]  ;;  %v62_v7 = vld [vmem:[#allocation3 + $0xf0] sm:$0xff]  ;;  %v77_v8 = vld [vmem:[#allocation3 + $0x168] sm:$0xff] }
   0x9   :  { %v95_v5 = vld [vmem:[#allocation3 + $0x1f8] sm:$0xff]  ;;  %212 = vmatpush.msra.mxu1 %v63_v3  ;;  %193 = vmatpush.msra.mxu0 %v46_v2  ;;  %v94_v9 = vld [vmem:[#allocation3 + $0x1f0] sm:$0xff]  ;;  %v61_v10 = vld [vmem:[#allocation3 + $0xe8] sm:$0xff] }
   0xa   :  { %252 = vmatpush.msra.mxu3 %v95_v5  ;;  %233 = vmatpush.msra.mxu2 %v78_v4  ;;  %v44_v11 = vld [vmem:[#allocation3 + $0x60] sm:$0xff]  ;;  %v93_v13 = vld [vmem:[#allocation3 + $0x1e8] sm:$0xff]  ;;  %v43_v16 = vld [vmem:[#allocation3 + $0x58] sm:$0xff] }
   0xb   :  { %213 = vmatpush.msra.mxu1 %v62_v7  ;;  %v76_v12 = vld [vmem:[#allocation3 + $0x160] sm:$0xff]  ;;  %194 = vmatpush.msra.mxu0 %v45_v6  ;;  %v75_v17 = vld [vmem:[#allocation3 + $0x158] sm:$0xff]  ;;  %v42_v20 = vld [vmem:[#allocation3 + $0x50] sm:$0xff] }
   0xc   :  { %253 = vmatpush.msra.mxu3 %v94_v9  ;;  %234 = vmatpush.msra.mxu2 %v77_v8  ;;  %v60_v14 = vld [vmem:[#allocation3 + $0xe0] sm:$0xff]  ;;  %v59_v18 = vld [vmem:[#allocation3 + $0xd8] sm:$0xff]  ;;  %v74_v21 = vld [vmem:[#allocation3 + $0x150] sm:$0xff] }
   0xd   :  { %v92_v15 = vld [vmem:[#allocation3 + $0x1e0] sm:$0xff]  ;;  %214 = vmatpush.msra.mxu1 %v61_v10  ;;  %195 = vmatpush.msra.mxu0 %v44_v11  ;;  %v91_v19 = vld [vmem:[#allocation3 + $0x1d8] sm:$0xff]  ;;  %v58_v22 = vld [vmem:[#allocation3 + $0xd0] sm:$0xff] }
   0xe   :  { %254 = vmatpush.msra.mxu3 %v93_v13  ;;  %235 = vmatpush.msra.mxu2 %v76_v12  ;;  %v90_v23 = vld [vmem:[#allocation3 + $0x1d0] sm:$0xff]  ;;  %v41_v24 = vld [vmem:[#allocation3 + $0x48] sm:$0xff]  ;;  %v40_v28 = vld [vmem:[#allocation3 + $0x40] sm:$0xff] }
   0xf   :  { %215 = vmatpush.msra.mxu1 %v60_v14  ;;  %196 = vmatpush.msra.mxu0 %v43_v16  ;;  %v73_v25 = vld [vmem:[#allocation3 + $0x148] sm:$0xff]  ;;  %v72_v29 = vld [vmem:[#allocation3 + $0x140] sm:$0xff]  ;;  %v39_v32 = vld [vmem:[#allocation3 + $0x38] sm:$0xff] }
  0x10   :  { %255 = vmatpush.msra.mxu3 %v92_v15  ;;  %236 = vmatpush.msra.mxu2 %v75_v17  ;;  %v57_v26 = vld [vmem:[#allocation3 + $0xc8] sm:$0xff]  ;;  %v56_v30 = vld [vmem:[#allocation3 + $0xc0] sm:$0xff]  ;;  %v71_v33 = vld [vmem:[#allocation3 + $0x138] sm:$0xff] }
  0x11   :  { %216 = vmatpush.msra.mxu1 %v59_v18  ;;  %197 = vmatpush.msra.mxu0 %v42_v20  ;;  %v89_v27 = vld [vmem:[#allocation3 + $0x1c8] sm:$0xff]  ;;  %v88_v31 = vld [vmem:[#allocation3 + $0x1c0] sm:$0xff]  ;;  %v55_v34 = vld [vmem:[#allocation3 + $0xb8] sm:$0xff] }
  0x12   :  { %256 = vmatpush.msra.mxu3 %v91_v19  ;;  %237 = vmatpush.msra.mxu2 %v74_v21  ;;  %v87_v35 = vld [vmem:[#allocation3 + $0x1b8] sm:$0xff]  ;;  %v38_v36 = vld [vmem:[#allocation3 + $0x30] sm:$0xff]  ;;  %v37_v40 = vld [vmem:[#allocation3 + $0x28] sm:$0xff] }
  0x13   :  { %217 = vmatpush.msra.mxu1 %v58_v22  ;;  %198 = vmatpush.msra.mxu0 %v41_v24  ;;  %v70_v37 = vld [vmem:[#allocation3 + $0x130] sm:$0xff]  ;;  %v69_v41 = vld [vmem:[#allocation3 + $0x128] sm:$0xff]  ;;  %v36_v44 = vld [vmem:[#allocation3 + $0x20] sm:$0xff] }
  0x14   :  { %257 = vmatpush.msra.mxu3 %v90_v23  ;;  %238 = vmatpush.msra.mxu2 %v73_v25  ;;  %v54_v38 = vld [vmem:[#allocation3 + $0xb0] sm:$0xff]  ;;  %v53_v42 = vld [vmem:[#allocation3 + $0xa8] sm:$0xff]  ;;  %v68_v45 = vld [vmem:[#allocation3 + $0x120] sm:$0xff] }
  0x15   :  { %218 = vmatpush.msra.mxu1 %v57_v26  ;;  %199 = vmatpush.msra.mxu0 %v40_v28  ;;  %v86_v39 = vld [vmem:[#allocation3 + $0x1b0] sm:$0xff]  ;;  %v85_v43 = vld [vmem:[#allocation3 + $0x1a8] sm:$0xff]  ;;  %v52_v46 = vld [vmem:[#allocation3 + $0xa0] sm:$0xff] }
  0x16   :  { %258 = vmatpush.msra.mxu3 %v89_v27  ;;  %239 = vmatpush.msra.mxu2 %v72_v29  ;;  %v84_v47 = vld [vmem:[#allocation3 + $0x1a0] sm:$0xff]  ;;  %v35_v48 = vld [vmem:[#allocation3 + $0x18] sm:$0xff]  ;;  %v34_v52 = vld [vmem:[#allocation3 + $0x10] sm:$0xff] }
  0x17   :  { %219 = vmatpush.msra.mxu1 %v56_v30  ;;  %200 = vmatpush.msra.mxu0 %v39_v32  ;;  %v67_v49 = vld [vmem:[#allocation3 + $0x118] sm:$0xff]  ;;  %v66_v53 = vld [vmem:[#allocation3 + $0x110] sm:$0xff]  ;;  %v33_v56 = vld [vmem:[#allocation3 + $0x8] sm:$0xff] }
  0x18   :  { %259 = vmatpush.msra.mxu3 %v88_v31  ;;  %240 = vmatpush.msra.mxu2 %v71_v33  ;;  %v51_v50 = vld [vmem:[#allocation3 + $0x98] sm:$0xff]  ;;  %v50_v54 = vld [vmem:[#allocation3 + $0x90] sm:$0xff]  ;;  %v65_v57 = vld [vmem:[#allocation3 + $0x108] sm:$0xff] }
  0x19   :  { %220 = vmatpush.msra.mxu1 %v55_v34  ;;  %201 = vmatpush.msra.mxu0 %v38_v36  ;;  %v83_v51 = vld [vmem:[#allocation3 + $0x198] sm:$0xff]  ;;  %v82_v55 = vld [vmem:[#allocation3 + $0x190] sm:$0xff]  ;;  %v49_v58 = vld [vmem:[#allocation3 + $0x88] sm:$0xff] }
  0x1a   :  { %260 = vmatpush.msra.mxu3 %v87_v35  ;;  %241 = vmatpush.msra.mxu2 %v70_v37  ;;  %v81_v59 = vld [vmem:[#allocation3 + $0x188] sm:$0xff]  ;;  %v32_v60 = vld [vmem:[#allocation3] sm:$0xff]  ;;  %v111_v62 = vld [vmem:[#allocation3 + $0x278] sm:$0xff] }
  0x1b   :  { %221 = vmatpush.msra.mxu1 %v54_v38  ;;  %202 = vmatpush.msra.mxu0 %v37_v40  ;;  %v64_v61 = vld [vmem:[#allocation3 + $0x100] sm:$0xff]  ;;  %v143_v63 = vld [vmem:[#allocation3 + $0x378] sm:$0xff]  ;;  %v110_v2 = vld [vmem:[#allocation3 + $0x270] sm:$0xff] }
  0x1c   :  { %261 = vmatpush.msra.mxu3 %v86_v39  ;;  %242 = vmatpush.msra.mxu2 %v69_v41  ;;  %v48_v0 = vld [vmem:[#allocation3 + $0x80] sm:$0xff]  ;;  %v127_v3 = vld [vmem:[#allocation3 + $0x2f8] sm:$0xff]  ;;  %v142_v4 = vld [vmem:[#allocation3 + $0x370] sm:$0xff] }
  0x1d   :  { %222 = vmatpush.msra.mxu1 %v53_v42  ;;  %203 = vmatpush.msra.mxu0 %v36_v44  ;;  %v80_v1 = vld [vmem:[#allocation3 + $0x180] sm:$0xff]  ;;  %v159_v5 = vld [vmem:[#allocation3 + $0x3f8] sm:$0xff]  ;;  %v109_v6 = vld [vmem:[#allocation3 + $0x268] sm:$0xff] }
  0x1e   :  { %262 = vmatpush.msra.mxu3 %v85_v43  ;;  %243 = vmatpush.msra.mxu2 %v68_v45  ;;  %v126_v7 = vld [vmem:[#allocation3 + $0x2f0] sm:$0xff]  ;;  %v141_v8 = vld [vmem:[#allocation3 + $0x368] sm:$0xff]  ;;  %v108_v10 = vld [vmem:[#allocation3 + $0x260] sm:$0xff] }
  0x1f   :  { %223 = vmatpush.msra.mxu1 %v52_v46  ;;  %204 = vmatpush.msra.mxu0 %v35_v48  ;;  %v158_v9 = vld [vmem:[#allocation3 + $0x3f0] sm:$0xff]  ;;  %v125_v11 = vld [vmem:[#allocation3 + $0x2e8] sm:$0xff]  ;;  %v140_v12 = vld [vmem:[#allocation3 + $0x360] sm:$0xff] }
  0x20   :  { %263 = vmatpush.msra.mxu3 %v84_v47  ;;  %244 = vmatpush.msra.mxu2 %v67_v49  ;;  %v157_v13 = vld [vmem:[#allocation3 + $0x3e8] sm:$0xff]  ;;  %v107_v14 = vld [vmem:[#allocation3 + $0x258] sm:$0xff]  ;;  %v124_v15 = vld [vmem:[#allocation3 + $0x2e0] sm:$0xff] }
  0x21   :  { %224 = vmatpush.msra.mxu1 %v51_v50  ;;  %205 = vmatpush.msra.mxu0 %v34_v52  ;;  %v139_v16 = vld [vmem:[#allocation3 + $0x358] sm:$0xff]  ;;  %v156_v17 = vld [vmem:[#allocation3 + $0x3e0] sm:$0xff]  ;;  %v106_v18 = vld [vmem:[#allocation3 + $0x250] sm:$0xff] }
  0x22   :  { %264 = vmatpush.msra.mxu3 %v83_v51  ;;  %245 = vmatpush.msra.mxu2 %v66_v53  ;;  %v123_v19 = vld [vmem:[#allocation3 + $0x2d8] sm:$0xff]  ;;  %v162_v20 = vld [vmem:[%s491_s2 + $0x10] sm:$0xff]  ;;  %v105_v23 = vld [vmem:[#allocation3 + $0x248] sm:$0xff] }
  0x23   :  { %225 = vmatpush.msra.mxu1 %v50_v54  ;;  %206 = vmatpush.msra.mxu0 %v33_v56  ;;  %v138_v21 = vld [vmem:[#allocation3 + $0x350] sm:$0xff]  ;;  %v155_v22 = vld [vmem:[#allocation3 + $0x3d8] sm:$0xff]  ;;  %v160_v25 = vld [vmem:[%s491_s2] sm:$0xff]  ;;  %v170_v28 = vmax.f32 %v162_v20, 1e-06 }
  0x24   :  { %265 = vmatpush.msra.mxu3 %v82_v55  ;;  %246 = vmatpush.msra.mxu2 %v65_v57  ;;  %v122_v24 = vld [vmem:[#allocation3 + $0x2d0] sm:$0xff]  ;;  %v137_v26 = vld [vmem:[#allocation3 + $0x348] sm:$0xff]  ;;  %v163_v29 = vld [vmem:[%s491_s2 + $0x18] sm:$0xff]  ;;  %v168_v34 = vmax.f32 %v160_v25, 1e-06 }
  0x25   :  { %226 = vmatpush.msra.mxu1 %v49_v58  ;;  %207 = vmatpush.msra.mxu0 %v32_v60  ;;  %v154_v27 = vld [vmem:[#allocation3 + $0x3d0] sm:$0xff]  ;;  %v104_v30 = vld [vmem:[#allocation3 + $0x240] sm:$0xff]  ;;  %v121_v31 = vld [vmem:[#allocation3 + $0x2c8] sm:$0xff]  ;;  %v171_v38 = vmax.f32 %v163_v29, 1e-06  ;;  %v178_v41 = vmul.f32 %v170_v28, %v170_v28 }
  0x26   :  { %266 = vmatpush.msra.mxu3 %v81_v59  ;;  %247 = vmatpush.msra.mxu2 %v64_v61  ;;  %v136_v32 = vld [vmem:[#allocation3 + $0x340] sm:$0xff]  ;;  %v153_v33 = vld [vmem:[#allocation3 + $0x3c8] sm:$0xff]  ;;  %v103_v36 = vld [vmem:[#allocation3 + $0x238] sm:$0xff]  ;;  %v176_v47 = vmul.f32 %v168_v34, %v168_v34 }
  0x27   :  { %272 = vmatpush.msrb.mxu0 %v111_v62  ;;  %227 = vmatpush.msra.mxu1 %v48_v0  ;;  %v161_v35 = vld [vmem:[%s491_s2 + $0x8] sm:$0xff]  ;;  %v120_v37 = vld [vmem:[#allocation3 + $0x2c0] sm:$0xff]  ;;  %v135_v39 = vld [vmem:[#allocation3 + $0x338] sm:$0xff]  ;;  %v179_v50 = vmul.f32 %v171_v38, %v171_v38  ;;  %v186_v53 = vmul.f32 %v178_v41, %v170_v28 }
  0x28   :  { %312 = vmatpush.msrb.mxu2 %v143_v63  ;;  %267 = vmatpush.msra.mxu3 %v80_v1  ;;  %v152_v40 = vld [vmem:[#allocation3 + $0x3c0] sm:$0xff]  ;;  %v102_v42 = vld [vmem:[#allocation3 + $0x230] sm:$0xff]  ;;  %v119_v43 = vld [vmem:[#allocation3 + $0x2b8] sm:$0xff]  ;;  %v169_v44 = vmax.f32 %v161_v35, 1e-06  ;;  %v184_v60 = vmul.f32 %v176_v47, %v168_v34 }
  0x29   :  { %273 = vmatpush.msrb.mxu0 %v110_v2  ;;  %292 = vmatpush.msrb.mxu1 %v127_v3  ;;  %v134_v45 = vld [vmem:[#allocation3 + $0x330] sm:$0xff]  ;;  %v151_v46 = vld [vmem:[#allocation3 + $0x3b8] sm:$0xff]  ;;  %v101_v48 = vld [vmem:[#allocation3 + $0x228] sm:$0xff]  ;;  %v187_v62 = vmul.f32 %v179_v50, %v171_v38 }
  0x2a   :  { %313 = vmatpush.msrb.mxu2 %v142_v4  ;;  %332 = vmatpush.msrb.mxu3 %v159_v5  ;;  %v118_v49 = vld [vmem:[#allocation3 + $0x2b0] sm:$0xff]  ;;  %v133_v51 = vld [vmem:[#allocation3 + $0x328] sm:$0xff]  ;;  %v100_v54 = vld [vmem:[#allocation3 + $0x220] sm:$0xff]  ;;  %v177_v55 = vmul.f32 %v169_v44, %v169_v44 }
  0x2b   :  { %274 = vmatpush.msrb.mxu0 %v109_v6  ;;  %293 = vmatpush.msrb.mxu1 %v126_v7  ;;  %v150_v52 = vld [vmem:[#allocation3 + $0x3b0] sm:$0xff]  ;;  %v164_v56 = vld [vmem:[%s491_s2 + $0x20] sm:$0xff]  ;;  %v117_v58 = vld [vmem:[#allocation3 + $0x2a8] sm:$0xff] }
  0x2c   :  { %314 = vmatpush.msrb.mxu2 %v141_v8  ;;  %333 = vmatpush.msrb.mxu3 %v158_v9  ;;  %v166_v57 = vld [vmem:[%s491_s2 + $0x30] sm:$0xff]  ;;  %v132_v59 = vld [vmem:[#allocation3 + $0x320] sm:$0xff]  ;;  %v149_v61 = vld [vmem:[#allocation3 + $0x3a8] sm:$0xff]  ;;  %v172_v2 = vmax.f32 %v164_v56, 1e-06  ;;  %v185_v6 = vmul.f32 %v177_v55, %v169_v44 }
  0x2d   :  { %275 = vmatpush.msrb.mxu0 %v108_v10  ;;  %294 = vmatpush.msrb.mxu1 %v125_v11  ;;  %v165_v63 = vld [vmem:[%s491_s2 + $0x28] sm:$0xff]  ;;  %v167_v0 = vld [vmem:[%s491_s2 + $0x38] sm:$0xff]  ;;  %v174_v3 = vmax.f32 %v166_v57, 1e-06  ;;  %v116_v4 = vld [vmem:[#allocation3 + $0x2a0] sm:$0xff]  ;;  %s438_s2 = smov [#allocation6]  }
  0x2e   :  { %315 = vmatpush.msrb.mxu2 %v140_v12  ;;  %334 = vmatpush.msrb.mxu3 %v157_v13  ;;  %v99_v1 = vld [vmem:[#allocation3 + $0x218] sm:$0xff]  ;;  %v148_v7 = vld [vmem:[#allocation3 + $0x3a0] sm:$0xff]  ;;  %v173_v8 = vmax.f32 %v165_v63, 1e-06  ;;  %v175_v9 = vmax.f32 %v167_v0, 1e-06 }
  0x2f   :  { %276 = vmatpush.msrb.mxu0 %v107_v14  ;;  %295 = vmatpush.msrb.mxu1 %v124_v15  ;;  %v131_v5 = vld [vmem:[#allocation3 + $0x318] sm:$0xff]  ;;  %v98_v10 = vld [vmem:[#allocation3 + $0x210] sm:$0xff]  ;;  %v180_v14 = vmul.f32 %v172_v2, %v172_v2  ;;  %v182_v15 = vmul.f32 %v174_v3, %v174_v3  ;;  %v145_v25 = vld [vmem:[#allocation3 + $0x388] sm:$0xff]  ;;  %s363_s6 = sshll.u32 %s438_s2, 4  ;;  %s364_s6 = int_to_ptr.vmem [resolvable:$true] %s363_s6 }
  0x30   :  { %316 = vmatpush.msrb.mxu2 %v139_v16  ;;  %335 = vmatpush.msrb.mxu3 %v156_v17  ;;  %v115_v11 = vld [vmem:[#allocation3 + $0x298] sm:$0xff]  ;;  %v130_v12 = vld [vmem:[#allocation3 + $0x310] sm:$0xff]  ;;  %v97_v16 = vld [vmem:[#allocation3 + $0x208] sm:$0xff]  ;;  %v181_v20 = vmul.f32 %v173_v8, %v173_v8 }
  0x31   :  { %277 = vmatpush.msrb.mxu0 %v106_v18  ;;  %296 = vmatpush.msrb.mxu1 %v123_v19  ;;  %v147_v13 = vld [vmem:[#allocation3 + $0x398] sm:$0xff]  ;;  %v114_v17 = vld [vmem:[#allocation3 + $0x290] sm:$0xff]  ;;  %v129_v18 = vld [vmem:[#allocation3 + $0x308] sm:$0xff] }
  0x32   :  { %317 = vmatpush.msrb.mxu2 %v138_v21  ;;  %336 = vmatpush.msrb.mxu3 %v155_v22  ;;  %v146_v19 = vld [vmem:[#allocation3 + $0x390] sm:$0xff]  ;;  %v183_v21 = vmul.f32 %v175_v9, %v175_v9  ;;  %v96_v22 = vld [vmem:[#allocation3 + $0x200] sm:$0xff] }
  0x33   :  { %278 = vmatpush.msrb.mxu0 %v105_v23  ;;  %297 = vmatpush.msrb.mxu1 %v122_v24  ;;  %v113_v23 = vld [vmem:[#allocation3 + $0x288] sm:$0xff]  ;;  %v128_v24 = vld [vmem:[#allocation3 + $0x300] sm:$0xff] }
  0x34   :  { %318 = vmatpush.msrb.mxu2 %v137_v26  ;;  %337 = vmatpush.msrb.mxu3 %v154_v27  ;;  %v188_v26 = vmul.f32 %v180_v14, %v172_v2  ;;  %v190_v27 = vmul.f32 %v182_v15, %v174_v3  ;;  %v112_v28 = vld [vmem:[#allocation3 + $0x280] sm:$0xff] }
  0x35   :  { %279 = vmatpush.msrb.mxu0 %v104_v30  ;;  %298 = vmatpush.msrb.mxu1 %v121_v31  ;;  %v144_v29 = vld [vmem:[#allocation3 + $0x380] sm:$0xff]  ;;  %v189_v30 = vmul.f32 %v181_v20, %v173_v8  ;;  %v191_v31 = vmul.f32 %v183_v21, %v175_v9 }
  0x36   :  { %319 = vmatpush.msrb.mxu2 %v136_v32  ;;  %338 = vmatpush.msrb.mxu3 %v153_v33 }
  0x37   :  { %280 = vmatpush.msrb.mxu0 %v103_v36  ;;  %299 = vmatpush.msrb.mxu1 %v120_v37 }
  0x38   :  { %320 = vmatpush.msrb.mxu2 %v135_v39  ;;  %339 = vmatpush.msrb.mxu3 %v152_v40 }
  0x39   :  { %281 = vmatpush.msrb.mxu0 %v102_v42  ;;  %300 = vmatpush.msrb.mxu1 %v119_v43 }
  0x3a   :  { %321 = vmatpush.msrb.mxu2 %v134_v45  ;;  %340 = vmatpush.msrb.mxu3 %v151_v46 }
  0x3b   :  { %282 = vmatpush.msrb.mxu0 %v101_v48  ;;  %301 = vmatpush.msrb.mxu1 %v118_v49 }
  0x3c   :  { %322 = vmatpush.msrb.mxu2 %v133_v51  ;;  %341 = vmatpush.msrb.mxu3 %v150_v52 }
  0x3d   :  { %248 = vmatmul.f32.vlgmr.msra.gmra.mxu2 %v186_v53  ;;  %283 = vmatpush.msrb.mxu0 %v100_v54 }
  0x3e   :  { %302 = vmatpush.msrb.mxu1 %v117_v58  ;;  %323 = vmatpush.msrb.mxu2 %v132_v59 }
  0x3f   :  { %342 = vmatpush.msrb.mxu3 %v149_v61  ;;  %208 = vmatmul.f32.vlgmr.msra.gmra.mxu0 %v184_v60 }
  0x40   :  { %268 = vmatmul.f32.vlgmr.msra.gmra.mxu3 %v187_v62  ;;  %284 = vmatpush.msrb.mxu0 %v99_v1 }
  0x41   :  { %303 = vmatpush.msrb.mxu1 %v116_v4  ;;  %324 = vmatpush.msrb.mxu2 %v131_v5 }
  0x42   :  { %343 = vmatpush.msrb.mxu3 %v148_v7  ;;  %228 = vmatmul.f32.vlgmr.msra.gmra.mxu1 %v185_v6 }
  0x43   :  { %285 = vmatpush.msrb.mxu0 %v98_v10  ;;  %304 = vmatpush.msrb.mxu1 %v115_v11 }
  0x44   :  { %325 = vmatpush.msrb.mxu2 %v130_v12  ;;  %344 = vmatpush.msrb.mxu3 %v147_v13 }
  0x45   :  { %286 = vmatpush.msrb.mxu0 %v97_v16  ;;  %305 = vmatpush.msrb.mxu1 %v114_v17 }
  0x46   :  { %326 = vmatpush.msrb.mxu2 %v129_v18  ;;  %345 = vmatpush.msrb.mxu3 %v146_v19 }
  0x47   :  { %287 = vmatpush.msrb.mxu0 %v96_v22  ;;  %306 = vmatpush.msrb.mxu1 %v113_v23 }
  0x48   :  { %327 = vmatpush.msrb.mxu2 %v128_v24  ;;  %346 = vmatpush.msrb.mxu3 %v145_v25 }
  0x49   :  { %288 = vmatmul.f32.vlgmr.msrb.gmra.mxu0 %v188_v26  ;;  %328 = vmatmul.f32.vlgmr.msrb.gmra.mxu2 %v190_v27 }
  0x4a   :  { %307 = vmatpush.msrb.mxu1 %v112_v28  ;;  %347 = vmatpush.msrb.mxu3 %v144_v29 }
  0x4b   :  { %308 = vmatmul.f32.vlgmr.msrb.gmra.mxu1 %v189_v30  ;;  %348 = vmatmul.f32.vlgmr.msrb.gmra.mxu3 %v191_v31 }
  0xbc   :  { %v209_v32 = vpop.f32.mrf.mxu0 }
  0xbf   :  { %v229_v33 = vpop.f32.mrf.mxu1 }
  0xc0   :  { %v230_v34 = vadd.f32 %v229_v33, %v209_v32  ;;  %v249_v35 = vpop.f32.mrf.mxu2 }
  0xc2   :  { %v250_v36 = vadd.f32 %v249_v35, %v230_v34 }
  0xc3   :  { %v269_v37 = vpop.f32.mrf.mxu3 }
  0xc4   :  { %v270_v38 = vadd.f32 %v269_v37, %v250_v36 }
  0xc6   :  { %v289_v39 = vpop.f32.mrf.mxu0 }
  0xc7   :  { %v290_v40 = vadd.f32 %v289_v39, %v270_v38 }
  0xc8   :  { %v309_v41 = vpop.f32.mrf.mxu1 }
  0xc9   :  { %v310_v42 = vadd.f32 %v309_v41, %v290_v40 }
  0xcc   :  { %v329_v43 = vpop.f32.mrf.mxu2 }
  0xcd   :  { %v330_v44 = vadd.f32 %v329_v43, %v310_v42 }
  0xce   :  { %v349_v45 = vpop.f32.mrf.mxu3 }
  0xcf   :  { %v350_v46 = vadd.f32 %v349_v45, %v330_v44 }
  0xd1   :  { %379 = vlog2.f32 %v350_v46 }
  0xd7   :  { %v380_v47 = vpop.eup %379 }
  0xd8   :  { %v353_v48 = vmul.f32 0.6931472, %v380_v47 }
  0xda   :  { %v354_v49 = vmul.f32 0.33333334, %v353_v48 }
  0xdc   :  { %v355_v50 = vmul.f32 1.442695, %v354_v49 }
  0xde   :  { %381 = vpow2.f32 %v355_v50 }
  0xe4   :  { %v382_v51 = vpop.eup %381 }
  0xe5   :  { %357 = vst [vmem:[#allocation6] sm:$0xff] %v382_v51 }
  0xe6   :  { %368 = dma.vmem_to_hbm [thread:$0]  %s364_s6, 128, %s366_s9, [#allocation5]  }
  0xe7   :  { %433 = dma.done.wait [#allocation5], 128  }
  0xe8   :  { %434 = vsyncadd [#allocation5], 4294967168 }
  0xe9   :  { %373 = vsyncpa [#allocation4], 1 }
  0xea   :  { %374 = vsyncpa [#allocation5], 1 }

</bundles_post_ra>
